<compile_context>
chip_gen: v6e
topology: v6e:2x2x1
jax: 0.10.0
libtpu: 0.0.40
codegen_flags: <defaults>
</compile_context>

<pallas_src>
import functools

import jax
import jax.numpy as jnp
from jax import lax
from jax.experimental import pallas as pl
from jax.experimental.pallas import tpu as pltpu


# --------------------------------------------------------------------------------------
# Kernel
# --------------------------------------------------------------------------------------
def _upconv_kernel(x_ref, g_ref, b_ref, bias_ref, o_ref, *, Nb, H, Ho, K, Twoc):
    """One (batch-block, output-column-tile) grid step.

    x_ref    : (Nb, H, W*Cin)   bf16, original (un-upsampled, un-padded) samples
    g_ref    : (K, Ho, H)       bf16 0/1 row-gather operators (H upsample + reflect pad)
    b_ref    : (W*Cin, K*Twoc)  bf16 banded weight operators for this column tile
                                (W upsample + reflect pad + kw/ci contraction)
    bias_ref : (1, Twoc)        f32 bias tiled over the output-W axis (this tile)
    o_ref    : (Nb, Ho, Twoc)   lane-dense output tile
    """
    WC = x_ref.shape[-1]
    xb = x_ref[...].reshape(Nb * H, WC)        # contiguous leading-dim merge, no transpose

    # Stage 1: one big MXU dot (M = Nb*H) producing all K per-tap partials Y_kh.
    yall = jnp.dot(xb, b_ref[...], preferred_element_type=jnp.float32)   # (Nb*H, K*Twoc)
    yall = yall.astype(b_ref.dtype)

    bias_b = jnp.broadcast_to(bias_ref[...], (Ho, Twoc)).astype(jnp.float32)
    g = [g_ref[kh] for kh in range(K)]         # (Ho, H) each, loaded once

    # Stage 2: per-sample row gather (H upsample + reflect pad) + tap accumulation.
    # Written out as each sample finishes so the live f32 accumulator stays ~8 vregs.
    for n in range(Nb):
        y_n = yall[n * H:(n + 1) * H]          # (H, K*Twoc) static, sublane-aligned slice
        acc = bias_b
        for kh in range(K):
            acc = acc + jnp.dot(g[kh], y_n[:, kh * Twoc:(kh + 1) * Twoc],
                                preferred_element_type=jnp.float32)
        o_ref[n] = acc.astype(o_ref.dtype)


# --------------------------------------------------------------------------------------
# Trace-time helpers
# --------------------------------------------------------------------------------------
def _reflect_nearest_index_map(padded_len, pad, up_len, scale):
    """Padded (post-upsample, post-ReflectionPad2d) index -> ORIGINAL index."""
    r = jnp.arange(padded_len) - pad                   # index on the upsampled grid
    r = jnp.where(r < 0, -r, r)                        # reflect, low side (-1 -> 1)
    r = jnp.where(r >= up_len, 2 * up_len - 2 - r, r)  # reflect, high side
    return r // scale                                  # nearest upsample -> source index


def _vmem_capacity_bytes():
    """Physical VMEM of the attached chip (64 MiB v7x, 128 MiB v5e/v6e); safe default."""
    try:
        return int(pltpu.get_tpu_info().vmem_capacity_bytes)
    except Exception:
        return 64 * 1024 * 1024


def _choose_batch_block(N, H, target_rows=256):
    """Largest divisor of N with Nb*H <= ~target_rows, keeping >= 2 grid steps if N >= 2."""
    cap = max(1, target_rows // max(H, 1))
    divs = [d for d in range(1, N + 1) if N % d == 0 and d <= cap]
    pref = [d for d in divs if N // d >= 2]            # leave >= 2 steps for dual-TC chips
    if pref:
        return max(pref)
    return max(divs) if divs else 1


def _choose_col_tile(WoC, per_col_bytes, budget_bytes):
    """Output-column tile (multiple of 128 dividing WoC) whose B tile fits the budget."""
    if 2 * WoC * per_col_bytes <= budget_bytes or WoC % 128 != 0:
        return WoC                                     # single tile
    best = 128
    for t in range(128, WoC, 128):
        if WoC % t == 0 and 2 * t * per_col_bytes <= budget_bytes:
            best = t
    return best


# --------------------------------------------------------------------------------------
# Forward pass
# --------------------------------------------------------------------------------------
def upsample_conv_layer_nhwc(x_nhwc, weight_oihw, bias, *, kernel_size, stride,
                             upsample=None, compute_dtype=jnp.bfloat16):
    """NHWC-native forward (preferred: keeps activations NHWC end-to-end, no transposes).

    x_nhwc      : (N, H, W, Cin)
    weight_oihw : (Cout, Cin, K, K)   PyTorch Conv2d layout
    bias        : (Cout,)
    returns     : (N, Ho, Wo, Cout)
    """
    N, H, W, Cin = x_nhwc.shape
    Cout = weight_oihw.shape[0]
    K, S = kernel_size, stride
    pad = K // 2
    U = upsample if upsample else 1

    Hu, Wu = H * U, W * U
    Hp, Wp = Hu + 2 * pad, Wu + 2 * pad
    Ho = (Hp - K) // S + 1
    Wo = (Wp - K) // S + 1
    WC, WoC = W * Cin, Wo * Cout
    out_dtype = x_nhwc.dtype

    # ----- trace-time constant operators (index math folded into the weights) -----
    rmap_h = _reflect_nearest_index_map(Hp, pad, Hu, U)                     # (Hp,)
    rmap_w = _reflect_nearest_index_map(Wp, pad, Wu, U)                     # (Wp,)

    # G[kh, ho, i] = 1 iff padded row (ho*S + kh) comes from original row i. Exact in bf16.
    src_h = rmap_h[jnp.arange(Ho)[None, :] * S + jnp.arange(K)[:, None]]    # (K, Ho)
    G = (src_h[:, :, None] == jnp.arange(H)[None, None, :]).astype(compute_dtype)

    # SelW[kw, wo, q] = 1 iff padded col (wo*S + kw) comes from original col q.
    src_w = rmap_w[jnp.arange(Wo)[None, :] * S + jnp.arange(K)[:, None]]    # (K, Wo)
    sel_w = (src_w[:, :, None] == jnp.arange(W)[None, None, :]).astype(jnp.float32)

    w_hwio = jnp.transpose(weight_oihw, (2, 3, 1, 0)).astype(jnp.float32)   # (K,K,Cin,Cout)
    # B[kh, q*Cin+ci, wo*Cout+co] = sum_kw SelW[kw,wo,q] * W[kh,kw,ci,co]
    B = jnp.einsum('kwq,hkio->hqiwo', sel_w, w_hwio).reshape(K, WC, WoC)

    # ----- tiling choices (batch blocking + generation-aware column tiling) -----
    vmem_phys = _vmem_capacity_bytes()
    cds = jnp.dtype(compute_dtype).itemsize
    ods = jnp.dtype(out_dtype).itemsize

    Nb = _choose_batch_block(N, H)
    Twoc = _choose_col_tile(WoC, K * WC * cds, max(vmem_phys // 8, 2 << 20))
    n_ct = WoC // Twoc

    # Re-order B so each output-column tile is contiguous with per-tap blocks inside it:
    # (K, WC, WoC) -> (WC, n_ct * K * Twoc); tile j = columns [j*K*Twoc, (j+1)*K*Twoc).
    Bcat = (B.reshape(K, WC, n_ct, Twoc)
             .transpose(1, 2, 0, 3)
             .reshape(WC, n_ct * K * Twoc)
             .astype(compute_dtype))

    x2d = x_nhwc.reshape(N, H, WC).astype(compute_dtype)                    # (N, H, W*Cin)
    bias_row = jnp.tile(bias.astype(jnp.float32), Wo).reshape(1, WoC)       # (1, Wo*Cout)

    kernel = functools.partial(_upconv_kernel, Nb=Nb, H=H, Ho=Ho, K=K, Twoc=Twoc)

    flops = 2 * N * K * WoC * (H * WC + Ho * H)
    bytes_accessed = (N * H * WC * cds + Bcat.size * cds + G.size * cds
                      + WoC * 4 + N * Ho * WoC * ods)

    per_step = (Nb * H * WC * cds + Nb * Ho * Twoc * ods
                + WC * K * Twoc * cds + K * Ho * H * cds + Twoc * 4)
    vmem_limit = int(min(max(32 << 20, 4 * per_step), (vmem_phys * 3) // 4))

    # ----- hot path: Pallas kernel on a (batch-block, column-tile) grid -----
    out2d = pl.pallas_call(
        kernel,
        out_shape=jax.ShapeDtypeStruct((N, Ho, WoC), out_dtype),
        grid_spec=pltpu.PrefetchScalarGridSpec(
            num_scalar_prefetch=0,
            grid=(N // Nb, n_ct),
            in_specs=[
                pl.BlockSpec((Nb, H, WC), lambda b, j: (b, 0, 0)),
                pl.BlockSpec((K, Ho, H), lambda b, j: (0, 0, 0)),
                pl.BlockSpec((WC, K * Twoc), lambda b, j: (0, j)),
                pl.BlockSpec((1, Twoc), lambda b, j: (0, j)),
            ],
            out_specs=pl.BlockSpec((Nb, Ho, Twoc), lambda b, j: (b, 0, j)),
        ),
        compiler_params=pltpu.CompilerParams(
            dimension_semantics=("parallel", "parallel"),
            vmem_limit_bytes=vmem_limit),
        cost_estimate=pl.CostEstimate(flops=flops, transcendentals=0,
                                      bytes_accessed=bytes_accessed),
    )(x2d, G, Bcat, bias_row)

    return out2d.reshape(N, Ho, Wo, Cout)


@functools.partial(jax.jit, static_argnames=("kernel_size", "stride", "upsample"))
def upsample_conv_layer(x_nchw, weight_oihw, bias, *, kernel_size, stride, upsample=None):
    """PyTorch-layout (NCHW) entry point matching UpsampleConvLayer.forward.

    NOTE: if the surrounding network can keep activations NHWC end-to-end, call
    upsample_conv_layer_nhwc directly and drop these two full-activation transposes —
    at realistic H,W they cost as much HBM traffic as the kernel itself.
    """
    x_nhwc = jnp.transpose(x_nchw, (0, 2, 3, 1))
    out_nhwc = upsample_conv_layer_nhwc(
        x_nhwc, weight_oihw, bias,
        kernel_size=kernel_size, stride=stride, upsample=upsample)
    return jnp.transpose(out_nhwc, (0, 3, 1, 2))       # NHWC -> NCHW


# --------------------------------------------------------------------------------------
# Demo / correctness check
# --------------------------------------------------------------------------------------
if __name__ == "__main__":
    # Module config: UpsampleConvLayer(in_channels=4, out_channels=8,
    #                                  kernel_size=3, stride=1, upsample=2)
    in_channels, out_channels = 4, 8
    kernel_size, stride, upsample = 3, 1, 2

    key = jax.random.PRNGKey(0)
    kx, kw, kb = jax.random.split(key, 3)

    x = jax.random.normal(kx, (2, in_channels, 16, 16), jnp.float32)
    weight = 0.1 * jax.random.normal(
        kw, (out_channels, in_channels, kernel_size, kernel_size), jnp.float32)
    bias = 0.1 * jax.random.normal(kb, (out_channels,), jnp.float32)

    out = upsample_conv_layer(x, weight, bias, kernel_size=kernel_size,
                              stride=stride, upsample=upsample)
    jax.block_until_ready(out)

    # Reference (pure JAX/XLA, f32): nearest upsample + reflect pad + conv.
    xr = jnp.repeat(jnp.repeat(x, upsample, axis=2), upsample, axis=3)
    pad = kernel_size // 2
    xr = jnp.pad(xr, ((0, 0), (0, 0), (pad, pad), (pad, pad)), mode="reflect")
    ref = lax.conv_general_dilated(
        xr, weight, window_strides=(stride, stride), padding="VALID",
        dimension_numbers=("NCHW", "OIHW", "NCHW")) + bias[None, :, None, None]

    assert out.shape == ref.shape, (out.shape, ref.shape)
    # bf16 operands with f32 accumulation: tolerance loosened vs the pure-f32 path.
    assert jnp.allclose(out, ref, atol=5e-2, rtol=5e-2), float(
        jnp.max(jnp.abs(out - ref)))
    print("KERNEL_OK")
</pallas_src>

<mosaic_0001>
module attributes {stable_mosaic.version = 11 : i64} {
  func.func @_upconv_kernel(%arg0: i32, %arg1: i32, %arg2: memref<1x16x64xbf16, #tpu.memory_space<vmem>>, %arg3: memref<3x32x16xbf16, #tpu.memory_space<vmem>>, %arg4: memref<64x768xbf16, #tpu.memory_space<vmem>>, %arg5: memref<1x256xf32, #tpu.memory_space<vmem>>, %arg6: memref<1x32x256xf32, #tpu.memory_space<vmem>>) attributes {dimension_semantics = [#tpu.dimension_semantics<parallel>, #tpu.dimension_semantics<parallel>], iteration_bounds = array<i64: 2, 1>, scalar_prefetch = 0 : i64, scratch_operands = 0 : i64, tpu.core_type = #tpu.core_type<tc>, window_params = [{transform_indices = @transform_0, window_bounds = array<i64: 1, 16, 64>}, {pipeline_mode = #tpu.pipeline_mode<synchronous>, transform_indices = @transform_1, window_bounds = array<i64: 3, 32, 16>}, {transform_indices = @transform_2, window_bounds = array<i64: 64, 768>}, {transform_indices = @transform_3, window_bounds = array<i64: 1, 256>}, {transform_indices = @transform_4, window_bounds = array<i64: 1, 32, 256>}]} {
    %c0 = arith.constant 0 : index
    %c0_0 = arith.constant 0 : index
    %c0_1 = arith.constant 0 : index
    %0 = vector.load %arg2[%c0, %c0_0, %c0_1] : memref<1x16x64xbf16, #tpu.memory_space<vmem>>, vector<1x16x64xbf16>
    %1 = vector.shape_cast %0 : vector<1x16x64xbf16> to vector<16x64xbf16>
    %c0_2 = arith.constant 0 : index
    %c0_3 = arith.constant 0 : index
    %2 = vector.load %arg4[%c0_2, %c0_3] : memref<64x768xbf16, #tpu.memory_space<vmem>>, vector<64x768xbf16>
    %cst = arith.constant dense<0.000000e+00> : vector<16x768xf32>
    %3 = tpu.matmul %1, %2, %cst {dimension_numbers = #tpu.dot_dimension_numbers<[1], [0], [0], [1], [0, 0, 1, 1], [], []>} : vector<16x64xbf16>, vector<64x768xbf16>, vector<16x768xf32> -> vector<16x768xf32>
    %4 = arith.truncf %3 : vector<16x768xf32> to vector<16x768xbf16>
    %c0_4 = arith.constant 0 : index
    %c0_5 = arith.constant 0 : index
    %5 = vector.load %arg5[%c0_4, %c0_5] : memref<1x256xf32, #tpu.memory_space<vmem>>, vector<1x256xf32>
    %6 = vector.shape_cast %5 : vector<1x256xf32> to vector<1x256xf32>
    %7 = vector.broadcast %6 : vector<1x256xf32> to vector<32x256xf32>
    %c0_6 = arith.constant 0 : index
    %c0_7 = arith.constant 0 : index
    %c0_8 = arith.constant 0 : index
    %8 = vector.load %arg3[%c0_6, %c0_7, %c0_8] : memref<3x32x16xbf16, #tpu.memory_space<vmem>>, vector<1x32x16xbf16>
    %9 = vector.shape_cast %8 : vector<1x32x16xbf16> to vector<32x16xbf16>
    %c1 = arith.constant 1 : index
    %c0_9 = arith.constant 0 : index
    %c0_10 = arith.constant 0 : index
    %10 = vector.load %arg3[%c1, %c0_9, %c0_10] : memref<3x32x16xbf16, #tpu.memory_space<vmem>>, vector<1x32x16xbf16>
    %11 = vector.shape_cast %10 : vector<1x32x16xbf16> to vector<32x16xbf16>
    %c2 = arith.constant 2 : index
    %c0_11 = arith.constant 0 : index
    %c0_12 = arith.constant 0 : index
    %12 = vector.load %arg3[%c2, %c0_11, %c0_12] : memref<3x32x16xbf16, #tpu.memory_space<vmem>>, vector<1x32x16xbf16>
    %13 = vector.shape_cast %12 : vector<1x32x16xbf16> to vector<32x16xbf16>
    %14 = vector.extract_strided_slice %4 {offsets = [0, 0], sizes = [16, 256], strides = [1, 1]} : vector<16x768xbf16> to vector<16x256xbf16>
    %cst_13 = arith.constant dense<0.000000e+00> : vector<32x256xf32>
    %15 = tpu.matmul %9, %14, %cst_13 {dimension_numbers = #tpu.dot_dimension_numbers<[1], [0], [0], [1], [0, 0, 1, 1], [], []>} : vector<32x16xbf16>, vector<16x256xbf16>, vector<32x256xf32> -> vector<32x256xf32>
    %16 = arith.addf %7, %15 : vector<32x256xf32>
    %17 = vector.extract_strided_slice %4 {offsets = [0, 256], sizes = [16, 256], strides = [1, 1]} : vector<16x768xbf16> to vector<16x256xbf16>
    %cst_14 = arith.constant dense<0.000000e+00> : vector<32x256xf32>
    %18 = tpu.matmul %11, %17, %cst_14 {dimension_numbers = #tpu.dot_dimension_numbers<[1], [0], [0], [1], [0, 0, 1, 1], [], []>} : vector<32x16xbf16>, vector<16x256xbf16>, vector<32x256xf32> -> vector<32x256xf32>
    %19 = arith.addf %16, %18 : vector<32x256xf32>
    %20 = vector.extract_strided_slice %4 {offsets = [0, 512], sizes = [16, 256], strides = [1, 1]} : vector<16x768xbf16> to vector<16x256xbf16>
    %cst_15 = arith.constant dense<0.000000e+00> : vector<32x256xf32>
    %21 = tpu.matmul %13, %20, %cst_15 {dimension_numbers = #tpu.dot_dimension_numbers<[1], [0], [0], [1], [0, 0, 1, 1], [], []>} : vector<32x16xbf16>, vector<16x256xbf16>, vector<32x256xf32> -> vector<32x256xf32>
    %22 = arith.addf %19, %21 : vector<32x256xf32>
    %c0_16 = arith.constant 0 : index
    %c0_17 = arith.constant 0 : index
    %c0_18 = arith.constant 0 : index
    %23 = vector.load %arg6[%c0_16, %c0_17, %c0_18] : memref<1x32x256xf32, #tpu.memory_space<vmem>>, vector<1x32x256xf32>
    %24 = vector.shape_cast %23 : vector<1x32x256xf32> to vector<32x256xf32>
    %25 = vector.shape_cast %22 : vector<32x256xf32> to vector<1x32x256xf32>
    tpu.vector_store %arg6[%c0_16, %c0_17, %c0_18], %25 {strides = array<i32>} : memref<1x32x256xf32, #tpu.memory_space<vmem>>, vector<1x32x256xf32>,
    return
  }
  func.func @transform_0(%arg0: i32, %arg1: i32) -> (i32, i32, i32) {
    %c0_i32 = arith.constant 0 : i32
    %c0_i32_0 = arith.constant 0 : i32
    %c0_i32_1 = arith.constant 0 : i32
    return %arg0, %c0_i32, %c0_i32_0 : i32, i32, i32
  }
  func.func @transform_1(%arg0: i32, %arg1: i32) -> (i32, i32, i32) {
    %c0_i32 = arith.constant 0 : i32
    %c0_i32_0 = arith.constant 0 : i32
    %c0_i32_1 = arith.constant 0 : i32
    %c0_i32_2 = arith.constant 0 : i32
    return %c0_i32, %c0_i32_0, %c0_i32_1 : i32, i32, i32
  }
  func.func @transform_2(%arg0: i32, %arg1: i32) -> (i32, i32) {
    %c0_i32 = arith.constant 0 : i32
    %c0_i32_0 = arith.constant 0 : i32
    return %c0_i32, %arg1 : i32, i32
  }
  func.func @transform_3(%arg0: i32, %arg1: i32) -> (i32, i32) {
    %c0_i32 = arith.constant 0 : i32
    %c0_i32_0 = arith.constant 0 : i32
    return %c0_i32, %arg1 : i32, i32
  }
  func.func @transform_4(%arg0: i32, %arg1: i32) -> (i32, i32, i32) {
    %c0_i32 = arith.constant 0 : i32
    %c0_i32_0 = arith.constant 0 : i32
    return %arg0, %c0_i32, %arg1 : i32, i32, i32
  }
}

</mosaic_0001>

<bundles_post_ra>
// kernel: tile.8
= control target key start
LH: loop header
LB: loop body
LE: loop exit
PB: predicated region body
PF: predicated region fallthrough
CT: control target
= control target key end

     0   :  { %s40_s0 = inlined_call_operand.vmem [shape: f32[8], index: 0, kind: input, shape index: {}]   ;;  %s41_s1 = inlined_call_operand.vmem [shape: f32[32,8], index: 1, kind: output, shape index: {}]  }
   0x1   :  { %v4_v0 = vld [vmem:[%s40_s0] ss:$0 sm:$0xff] }
   0x2   :  { %5 = vst [vmem:[%s41_s1] sm:$0xff] %v4_v0  ;;  %12 = vst [vmem:[%s41_s1 + $0x8] sm:$0xff] %v4_v0 }
   0x3   :  { %13 = vst [vmem:[%s41_s1 + $0x10] sm:$0xff] %v4_v0  ;;  %14 = vst [vmem:[%s41_s1 + $0x18] sm:$0xff] %v4_v0 }

// kernel: tile.9
= control target key start
LH: loop header
LB: loop body
LE: loop exit
PB: predicated region body
PF: predicated region fallthrough
CT: control target
= control target key end

     0   :  { %s7_s6 = smov 3  ;;  %s21_s9 = smov 3  ;;  %vm4_vm0 = vcmask 64512   ;;  %vm11_vm1 = vcmask 1048512   ;;  %vm18_vm2 = vcmask 982912   ;;  %vm25_vm3 = vcmask 917312   ;;  %s235_s0 = inlined_call_operand.vmem [shape: f32[32,8], index: 0, kind: input, shape index: {}]   ;;  %s236_s1 = inlined_call_operand.vmem [shape: f32[1,256], index: 1, kind: output, shape index: {}]  }
   0x1   :  { %v125_v0 = vld [vmem:[%s235_s0 + $0xf] ss:$16 sm:%s7_s6]   ;;  %s156_s10 = smov 120   ;;  %v127_v1 = vld [vmem:[%s235_s0 + $0xd] ss:$16 sm:%s21_s9]   ;;  %s14_s13 = smov 3 }
   0x2   :  { %9 = vrot.lane.b32.xlu0 %v125_v0, %s156_s10  ;;  %s157_s14 = smov 104   ;;  %v126_v2 = vld [vmem:[%s235_s0 + $0xe] ss:$16 sm:%s14_s13]   ;;  %s28_s17 = smov 3  ;;  %vm32_vm4 = vcmask 851712   ;;  %vm39_vm5 = vcmask 786112  }
   0x3   :  { %23 = vrot.lane.b32.xlu1 %v127_v1, %s157_s14  ;;  %v128_v3 = vld [vmem:[%s235_s0 + $0xc] ss:$16 sm:%s28_s17]   ;;  %s35_s20 = smov 3  ;;  %s42_s21 = smov 3  ;;  %vm46_vm6 = vcmask 720512   ;;  %vm53_vm7 = vcmask 654912  }
   0x4   :  { %s158_s22 = smov 112   ;;  %s159_s23 = smov 96   ;;  %v129_v4 = vld [vmem:[%s235_s0 + $0xb] ss:$16 sm:%s35_s20]   ;;  %v130_v5 = vld [vmem:[%s235_s0 + $0xa] ss:$16 sm:%s42_s21]  }
   0x5   :  { %s49_s28 = smov 3  ;;  %s56_s29 = smov 3  ;;  %vm60_vm8 = vcmask 589312   ;;  %vm67_vm9 = vcmask 523712   ;;  %vm74_vm10 = vcmask 458112   ;;  %vm81_vm11 = vcmask 392512  }
   0x6   :  { %16 = vrot.lane.b32.xlu0 %v126_v2, %s158_s22  ;;  %s160_s30 = smov 88   ;;  %s161_s2 = smov 80   ;;  %v131_v6 = vld [vmem:[%s235_s0 + $0x9] ss:$16 sm:%s49_s28]   ;;  %vm88_vm12 = vcmask 326912   ;;  %vm95_vm13 = vcmask 261312  }
   0x7   :  { %30 = vrot.lane.b32.xlu1 %v128_v3, %s159_s23  ;;  %v132_v7 = vld [vmem:[%s235_s0 + $0x8] ss:$16 sm:%s56_s29]   ;;  %s63_s7 = smov 3  ;;  %s70_s8 = smov 3  ;;  %vm102_vm14 = vcmask 195712   ;;  %vm109_vm15 = vcmask 130112  }
   0x8   :  { %s162_s9 = smov 72   ;;  %s163_s10 = smov 64   ;;  %v133_v8 = vld [vmem:[%s235_s0 + $0x7] ss:$16 sm:%s63_s7]   ;;  %v134_v9 = vld [vmem:[%s235_s0 + $0x6] ss:$16 sm:%s70_s8]  }
   0x9   :  { %s2_s13 = smov 3  ;;  %s77_s16 = smov 3 }
   0xa   :  { %37 = vrot.lane.b32.xlu0 %v129_v4, %s160_s30  ;;  %v3_v10 = vld [vmem:[%s235_s0] ss:$16 sm:%s2_s13]   ;;  %s84_s19 = smov 3  ;;  %s164_s20 = smov 56  }
   0xb   :  { %44 = vrot.lane.b32.xlu1 %v130_v5, %s161_s2  ;;  %5 = vst.msk [vmem:[#allocation0] ss:$8 sm:$0x3] %vm4_vm0, %v3_v10   ;;  %s165_s21 = smov 48   ;;  %v135_v11 = vld [vmem:[%s235_s0 + $0x5] ss:$16 sm:%s77_s16]  }
   0xc   :  { %v136_v12 = vld [vmem:[%s235_s0 + $0x4] ss:$16 sm:%s84_s19]   ;;  %s91_s26 = smov 3  ;;  %s98_s27 = smov 3 }
   0xd   :  { %s166_s28 = smov 40   ;;  %s167_s29 = smov 32   ;;  %v137_v13 = vld [vmem:[%s235_s0 + $0x3] ss:$16 sm:%s91_s26]   ;;  %v138_v14 = vld [vmem:[%s235_s0 + $0x2] ss:$16 sm:%s98_s27]  }
   0xe   :  { %51 = vrot.lane.b32.xlu0 %v131_v6, %s162_s9  ;;  %s105_s5 = smov 3  ;;  %s168_s6 = smov 24  }
   0xf   :  { %58 = vrot.lane.b32.xlu1 %v132_v7, %s163_s10  ;;  %s169_s7 = smov 16   ;;  %v139_v15 = vld [vmem:[%s235_s0 + $0x1] ss:$16 sm:%s105_s5]   ;;  %s170_s0 = smov 8  }
  0x12   :  { %65 = vrot.lane.b32.xlu0 %v133_v8, %s164_s20 }
  0x13   :  { %72 = vrot.lane.b32.xlu1 %v134_v9, %s165_s21 }
  0x16   :  { %79 = vrot.lane.b32.xlu0 %v135_v11, %s166_s28 }
  0x17   :  { %86 = vrot.lane.b32.xlu1 %v136_v12, %s167_s29 }
  0x1a   :  { %93 = vrot.lane.b32.xlu0 %v137_v13, %s168_s6 }
  0x1b   :  { %100 = vrot.lane.b32.xlu1 %v138_v14, %s169_s7 }
  0x1e   :  { %107 = vrot.lane.b32.xlu0 %v139_v15, %s170_s0 }
  0x74   :  { %v10_v16 = vpop.permute.xlu0 %9  }
  0x75   :  { %12 = vst.msk [vmem:[#allocation0] ss:$8 sm:$0x3] %vm11_vm1, %v10_v16   ;;  %v24_v17 = vpop.permute.xlu1 %23  }
  0x78   :  { %v17_v18 = vpop.permute.xlu0 %16  }
  0x79   :  { %19 = vst.msk [vmem:[#allocation0] ss:$8 sm:$0x3] %vm18_vm2, %v17_v18   ;;  %v31_v19 = vpop.permute.xlu1 %30  }
  0x7a   :  { %26 = vst.msk [vmem:[#allocation0] ss:$8 sm:$0x3] %vm25_vm3, %v24_v17  }
  0x7b   :  { %33 = vst.msk [vmem:[#allocation0] ss:$8 sm:$0x3] %vm32_vm4, %v31_v19  }
  0x7c   :  { %v38_v20 = vpop.permute.xlu0 %37  }
  0x7d   :  { %40 = vst.msk [vmem:[#allocation0] ss:$8 sm:$0x3] %vm39_vm5, %v38_v20   ;;  %v45_v21 = vpop.permute.xlu1 %44  }
  0x7e   :  { %47 = vst.msk [vmem:[#allocation0] ss:$8 sm:$0x3] %vm46_vm6, %v45_v21  }
  0x80   :  { %v52_v22 = vpop.permute.xlu0 %51  }
  0x81   :  { %54 = vst.msk [vmem:[#allocation0] ss:$8 sm:$0x3] %vm53_vm7, %v52_v22   ;;  %v59_v23 = vpop.permute.xlu1 %58  }
  0x82   :  { %61 = vst.msk [vmem:[#allocation0] ss:$8 sm:$0x3] %vm60_vm8, %v59_v23  }
  0x84   :  { %v66_v24 = vpop.permute.xlu0 %65  }
  0x85   :  { %68 = vst.msk [vmem:[#allocation0] ss:$8 sm:$0x3] %vm67_vm9, %v66_v24   ;;  %v73_v25 = vpop.permute.xlu1 %72  }
  0x86   :  { %75 = vst.msk [vmem:[#allocation0] ss:$8 sm:$0x3] %vm74_vm10, %v73_v25  }
  0x88   :  { %v80_v26 = vpop.permute.xlu0 %79  }
  0x89   :  { %82 = vst.msk [vmem:[#allocation0] ss:$8 sm:$0x3] %vm81_vm11, %v80_v26   ;;  %v87_v27 = vpop.permute.xlu1 %86  }
  0x8a   :  { %89 = vst.msk [vmem:[#allocation0] ss:$8 sm:$0x3] %vm88_vm12, %v87_v27  }
  0x8c   :  { %v94_v28 = vpop.permute.xlu0 %93  }
  0x8d   :  { %96 = vst.msk [vmem:[#allocation0] ss:$8 sm:$0x3] %vm95_vm13, %v94_v28   ;;  %v101_v29 = vpop.permute.xlu1 %100  }
  0x8e   :  { %103 = vst.msk [vmem:[#allocation0] ss:$8 sm:$0x3] %vm102_vm14, %v101_v29  }
  0x90   :  { %v108_v30 = vpop.permute.xlu0 %107  }
  0x91   :  { %110 = vst.msk [vmem:[#allocation0] ss:$8 sm:$0x3] %vm109_vm15, %v108_v30  }
  0x98   :  { %v115_v31 = vld [vmem:[#allocation0] sm:$0x1]  ;;  %v120_v32 = vld [vmem:[#allocation0 + $0x8] sm:$0x1] }
  0x99   :  { %118 = vst [vmem:[%s236_s1] sm:$0x1] %v115_v31  ;;  %140 = vst [vmem:[%s236_s1 + $0x1] sm:$0x1] %v120_v32 }

// kernel: upsample_conv_layer.1
= control target key start
LH: loop header
LB: loop body
LE: loop exit
PB: predicated region body
PF: predicated region fallthrough
CT: control target
= control target key end

     0   :  { %s1108_s15 = smov 0   ;;  %s1110_s16 = smov 0   ;;  %s1266_s0 = inlined_call_operand.vmem [shape: bf16[2,16,64], index: 0, kind: input, shape index: {}]   ;;  %s1267_s1 = inlined_call_operand.vmem [shape: bf16[3,32,16], index: 1, kind: input, shape index: {}]   ;;  %s1268_s2 = inlined_call_operand.vmem [shape: bf16[64,768], index: 2, kind: input, shape index: {}]   ;;  %s1269_s3 = inlined_call_operand.vmem [shape: f32[1,256], index: 3, kind: input, shape index: {}]   ;;  %s1270_s4 = inlined_call_operand.vmem [shape: f32[2,32,256], index: 4, kind: output, shape index: {}]  }
   0x1   :  { %s1112_s17 = smov 0  }
   0x2 LB: > { %s26_s18 = sadd.s32 1, %s1076_s16  ;;  %p933_p0 = scmp.ge.s32.totalorder %s1080_s17, 1  ;;  %s1080_s17 = sphi %s1112_s17, %s14_s17   ;;  %s1076_s16 = sphi %s1110_s16, %s1272_s16   ;;  %s1072_s15 = sphi %s1108_s15, %s1271_s15  }
   0x3   : > { %p28_p1 = scmp.ge.s32.totalorder %s26_s18, 2  ;;  %p197_p2 = scmp.lt.s32.totalorder %s1080_s17, 3 }
   0x5   : > { %s1274_s18 = smov (%p28_p1, %s26_s18), 0  ;;  %p198_p3 = pnand %p933_p0, %p197_p2 }
   0x6   : > { %p236_p4 = scmp.lt.s32.totalorder (!%p198_p3), %s1072_s15, 1 }
   0x7   : > { %201 = sbr.rel (%p198_p3) target bundleno = 461 (0x1cd), region = 36 }
   0xc   : > { %v1015_v0 = vld [vmem:[%s1268_s2 + $0x94] ss:$24 sps:$4 sm:$0xff]   ;;  %v1017_v1 = vld [vmem:[%s1268_s2 + $0x90] ss:$24 sps:$4 sm:$0xff]   ;;  %v1082_v2 = vmov 0   ;;  %s1276_s15 = smov (!%p236_p4, %s1072_s15), 1  ;;  %v555_v50 = vlaneseq }
   0xd   : > { %450 = vmatprep.mubr.bf16.mxu0 %v1082_v2  ;;  %493 = vmatprep.mubr.bf16.mxu1 %v1082_v2  ;;  %v1018_v3 = vld [vmem:[%s1268_s2 + $0x64] ss:$24 sps:$4 sm:$0xff]   ;;  %v1020_v4 = vld [vmem:[%s1268_s2 + $0x60] ss:$24 sps:$4 sm:$0xff]   ;;  %v1021_v5 = vld [vmem:[%s1268_s2 + $0x34] ss:$24 sps:$4 sm:$0xff]  }
   0xe   : > { %426 = vmatprep.subr.bf16.mxu0 %v1015_v0  ;;  %v1024_v6 = vld [vmem:[%s1268_s2 + $0x9c] ss:$24 sps:$4 sm:$0xff]   ;;  %s988_s5 = sshll.u32 %s1276_s15, 3  ;;  %v1026_v7 = vld [vmem:[%s1268_s2 + $0x98] ss:$24 sps:$4 sm:$0xff]   ;;  %vm414_vm0 = vcmask 523264  }
   0xf   : > { %427 = vmatpush1.bf16.msra.mxu0 %v1017_v1  ;;  %v1023_v8 = vld [vmem:[%s1268_s2 + $0x30] ss:$24 sps:$4 sm:$0xff]   ;;  %469 = vmatprep.subr.bf16.mxu1 %v1024_v6  ;;  %v1030_v9 = vld [vmem:[%s1268_s2 + $0x6c] ss:$24 sps:$4 sm:$0xff]   ;;  %s240_s20 = scalar_lea.vmem %s1266_s0, %s988_s5  ;;  %v1029_v12 = vld [vmem:[%s1268_s2] ss:$24 sps:$4 sm:$0xff]  }
  0x10   : > { %428 = vmatprep.subr.bf16.mxu0 %v1018_v3  ;;  %470 = vmatpush1.bf16.msra.mxu1 %v1026_v7  ;;  %v1032_v10 = vld [vmem:[%s1268_s2 + $0x68] ss:$24 sps:$4 sm:$0xff]   ;;  %v1027_v11 = vld [vmem:[%s1268_s2 + $0x4] ss:$24 sps:$4 sm:$0xff]   ;;  %v1039_v14 = vld [vmem:[%s1268_s2 + $0x38] ss:$24 sps:$4 sm:$0xff]  }
  0x11   : > { %471 = vmatprep.subr.bf16.mxu1 %v1030_v9  ;;  %v1037_v13 = vld [vmem:[%s1268_s2 + $0x3c] ss:$24 sps:$4 sm:$0xff]   ;;  %v1043_v16 = vld [vmem:[%s1268_s2 + $0xc] ss:$24 sps:$4 sm:$0xff]   ;;  %v1034_v18 = vld [vmem:[%s1268_s2 + $0xa0] ss:$24 sps:$4 sm:$0xff]  }
  0x12   : > { %v1036_v15 = vld [vmem:[%s1268_s2 + $0xa4] ss:$24 sps:$4 sm:$0xff]   ;;  %v1045_v19 = vld [vmem:[%s1268_s2 + $0x8] ss:$24 sps:$4 sm:$0xff]   ;;  %v1042_v20 = vld [vmem:[%s1268_s2 + $0x74] ss:$24 sps:$4 sm:$0xff]  }
  0x13   : > { %429 = vmatpush1.bf16.msra.mxu0 %v1020_v4  ;;  %v1033_v17 = vld [vmem:[%s240_s20] sm:$0xff]   ;;  %v1040_v21 = vld [vmem:[%s1268_s2 + $0x70] ss:$24 sps:$4 sm:$0xff]   ;;  %v1051_v24 = vld [vmem:[%s1268_s2 + $0x14] ss:$24 sps:$4 sm:$0xff]   ;;  %vm589_vm1 = vcmask 130048  }
  0x14   : > { %430 = vmatprep.subr.bf16.mxu0 %v1021_v5  ;;  %472 = vmatpush1.bf16.msra.mxu1 %v1032_v10  ;;  %v1048_v22 = vld [vmem:[%s1268_s2 + $0x44] ss:$24 sps:$4 sm:$0xff]   ;;  %v1046_v23 = vld [vmem:[%s1268_s2 + $0x40] ss:$24 sps:$4 sm:$0xff]   ;;  %v1049_v25 = vld [vmem:[%s1268_s2 + $0x10] ss:$24 sps:$4 sm:$0xff]  }
  0x15   : > { %473 = vmatprep.subr.bf16.mxu1 %v1037_v13  ;;  %v1052_v35 = vld [vmem:[%s1267_s1] sm:$0xff]   ;;  %v1054_v39 = vld [vmem:[%s1267_s1 + $0x10] sm:$0xff]   ;;  %v1053_v41 = vld [vmem:[%s1267_s1 + $0x8] sm:$0xff]   ;;  %v556_v51 = vshrl.u32 %v555_v50, 7  ;;  %s989_s19 = sshll.u32 %s1276_s15, 6 }
  0x16   : > { %v1056_v44 = vld [vmem:[%s1267_s1 + $0x18] sm:$0xff]   ;;  %v1055_v48 = vld [vmem:[%s1267_s1 + $0x20] sm:$0xff]   ;;  %v1057_v49 = vld [vmem:[%s1267_s1 + $0x28] sm:$0xff]   ;;  %s1247_s22 = scalar_lea.vmem %s1270_s4, %s989_s19 }
  0x17   : > { %431 = vmatpush1.bf16.msra.mxu0 %v1023_v8  ;;  %v557_v54 = vsub.s32 0, %v556_v51  ;;  %v553_v55 = vld [vmem:[%s1269_s3] sm:$0x3]  ;;  %v561_v58 = vsub.s32 1, %v556_v51 }
  0x18   : > { %432 = vmatprep.subr.bf16.mxu0 %v1027_v11  ;;  %474 = vmatpush1.bf16.msra.mxu1 %v1039_v14 }
  0x19   : > { %475 = vmatprep.subr.bf16.mxu1 %v1043_v16  ;;  %v558_v61 = vrot.slane %v553_v55, %v557_v54  ;;  %v562_v0 = vrot.slane %v553_v55, %v561_v58 }
  0x1b   : > { %433 = vmatpush1.bf16.msra.mxu0 %v1029_v12 }
  0x1c   : > { %512 = vmatprep.subr.bf16.mxu0 %v1036_v15  ;;  %476 = vmatpush1.bf16.msra.mxu1 %v1045_v19 }
  0x1e   : > { %963 = vmatmul.mubr.msk.bf16.vlgmr.msra.gmra.mxu0 %vm414_vm0, %v1033_v17 }
  0x1f   : > { %513 = vmatpush1.bf16.msra.mxu0 %v1034_v18  ;;  %536 = vmatprep.mubr.bf16.mxu0 %v1082_v2 }
  0x20   : > { %514 = vmatprep.subr.bf16.mxu0 %v1042_v20  ;;  %964 = vmatmul.mubr.msk.bf16.vlgmr.msra.gmra.mxu1 %vm414_vm0, %v1033_v17 }
  0x21   : > { %628 = vmatprep.mubr.bf16.mxu1 %v1082_v2 }
  0x23   : > { %515 = vmatpush1.bf16.msra.mxu0 %v1040_v21 }
  0x24   : > { %516 = vmatprep.subr.bf16.mxu0 %v1048_v22 }
  0x27   : > { %517 = vmatpush1.bf16.msra.mxu0 %v1046_v23 }
  0x28   : > { %518 = vmatprep.subr.bf16.mxu0 %v1051_v24 }
  0x2b   : > { %519 = vmatpush1.bf16.msra.mxu0 %v1049_v25 }
  0x2e   : > { %965 = vmatmul.mubr.msk.bf16.vlgmr.msra.gmra.mxu0 %vm414_vm0, %v1033_v17 }
  0x2f   : > { %705 = vmatprep.mubr.bf16.mxu0 %v1082_v2 }
  0xde   : > { %v452_v26 = vpop.f32.mrf.mxu0 }
  0xe0   : > { %v454_v27 = vpop.f32.mrf.mxu0  ;;  %v495_v29 = vpop.f32.mrf.mxu1 }
  0xe2   : > { %v456_v28 = vpop.f32.mrf.mxu0  ;;  %v497_v31 = vpop.f32.mrf.mxu1 }
  0xe3   : > { %v547_v33 = vpack.c.bf16 %v456_v28, %v452_v26 }
  0xe4   : > { %v458_v30 = vpop.f32.mrf.mxu0  ;;  %v499_v34 = vpop.f32.mrf.mxu1 }
  0xe5   : > { %v548_v32 = vpack.c.bf16 %v458_v30, %v454_v27  ;;  %v549_v36 = vpack.c.bf16 %v499_v34, %v495_v29 }
  0xe6   : > { %v501_v37 = vpop.f32.mrf.mxu1 }
  0xe7   : > { %610 = vmatprep.subr.bf16.mxu1 %v548_v32  ;;  %v550_v38 = vpack.c.bf16 %v501_v37, %v497_v31 }
  0xe8   : > { %611 = vmatpush1.bf16.msra.mxu1 %v547_v33 }
  0xe9   : > { %687 = vmatprep.subr.bf16.mxu0 %v550_v38 }
  0xea   : > { %688 = vmatpush1.bf16.msra.mxu0 %v549_v36 }
  0xeb   : > { %976 = vmatmul.mubr.msk.bf16.vlgmr.msra.gmra.mxu1 %vm589_vm1, %v1052_v35 }
  0xec   : > { %638 = vmatprep.mubr.bf16.mxu1 %v1082_v2 }
  0xed   : > { %980 = vmatmul.mubr.msk.bf16.vlgmr.msra.gmra.mxu0 %vm589_vm1, %v1054_v39 }
  0xee   : > { %v538_v40 = vpop.f32.mrf.mxu0  ;;  %715 = vmatprep.mubr.bf16.mxu0 %v1082_v2 }
  0xf0   : > { %v540_v42 = vpop.f32.mrf.mxu0 }
  0xf2   : > { %v542_v43 = vpop.f32.mrf.mxu0 }
  0xf3   : > { %977 = vmatmul.mubr.msk.bf16.gmra.mxu1 %vm589_vm1, %v1053_v41  ;;  %v551_v47 = vpack.c.bf16 %v542_v43, %v538_v40 }
  0xf4   : > { %v544_v45 = vpop.f32.mrf.mxu0  ;;  %782 = vmatprep.mubr.bf16.mxu1 %v1082_v2 }
  0xf5   : > { %v552_v46 = vpack.c.bf16 %v544_v45, %v540_v42  ;;  %981 = vmatmul.mubr.msk.bf16.gmra.mxu0 %vm589_vm1, %v1056_v44 }
  0xf7   : > { %764 = vmatprep.subr.bf16.mxu1 %v552_v46 }
  0xf8   : > { %765 = vmatpush1.bf16.msra.mxu1 %v551_v47 }
  0xfb   : > { %984 = vmatmul.mubr.msk.bf16.vlgmr.msra.gmra.mxu1 %vm589_vm1, %v1055_v48 }
  0xfc   : > { %792 = vmatprep.mubr.bf16.mxu1 %v1082_v2 }
 0x103   : > { %985 = vmatmul.mubr.msk.bf16.gmra.mxu1 %vm589_vm1, %v1057_v49 }
 0x1ab   : > { %v630_v52 = vpop.f32.mrf.mxu1 }
 0x1ac   : > { %v649_v3 = vadd.f32 %v630_v52, %v558_v61 }
 0x1ad   : > { %v632_v53 = vpop.f32.mrf.mxu1  ;;  %v707_v57 = vpop.f32.mrf.mxu0 }
 0x1ae   : > { %v650_v5 = vadd.f32 %v632_v53, %v562_v0  ;;  %v726_v9 = vadd.f32 %v707_v57, %v649_v3 }
 0x1af   : > { %v634_v56 = vpop.f32.mrf.mxu1  ;;  %v709_v60 = vpop.f32.mrf.mxu0 }
 0x1b0   : > { %v651_v8 = vadd.f32 %v634_v56, %v558_v61  ;;  %v727_v12 = vadd.f32 %v709_v60, %v650_v5 }
 0x1b1   : > { %v636_v59 = vpop.f32.mrf.mxu1  ;;  %v711_v63 = vpop.f32.mrf.mxu0 }
 0x1b2   : > { %v652_v11 = vadd.f32 %v636_v59, %v562_v0  ;;  %v728_v17 = vadd.f32 %v711_v63, %v651_v8 }
 0x1b3   : > { %v640_v62 = vpop.f32.mrf.mxu1  ;;  %v713_v2 = vpop.f32.mrf.mxu0 }
 0x1b4   : > { %v653_v16 = vadd.f32 %v640_v62, %v558_v61  ;;  %v729_v21 = vadd.f32 %v713_v2, %v652_v11 }
 0x1b5   : > { %v642_v1 = vpop.f32.mrf.mxu1  ;;  %v717_v7 = vpop.f32.mrf.mxu0 }
 0x1b6   : > { %v654_v20 = vadd.f32 %v642_v1, %v562_v0  ;;  %v730_v26 = vadd.f32 %v717_v7, %v653_v16 }
 0x1b7   : > { %v644_v4 = vpop.f32.mrf.mxu1  ;;  %v719_v15 = vpop.f32.mrf.mxu0 }
 0x1b8   : > { %v655_v25 = vadd.f32 %v644_v4, %v558_v61  ;;  %v731_v30 = vadd.f32 %v719_v15, %v654_v20 }
 0x1b9   : > { %v646_v6 = vpop.f32.mrf.mxu1  ;;  %v721_v23 = vpop.f32.mrf.mxu0 }
 0x1ba   : > { %v656_v29 = vadd.f32 %v646_v6, %v562_v0  ;;  %v732_v34 = vadd.f32 %v721_v23, %v655_v25 }
 0x1bb   : > { %v784_v10 = vpop.f32.mrf.mxu1  ;;  %v723_v32 = vpop.f32.mrf.mxu0 }
 0x1bc   : > { %v803_v13 = vadd.f32 %v784_v10, %v726_v9  ;;  %v733_v37 = vadd.f32 %v723_v32, %v656_v29 }
 0x1bd   : > { %v786_v14 = vpop.f32.mrf.mxu1 }
 0x1be   : > { %811 = vst [vmem:[%s1247_s22] sm:$0xff] %v803_v13  ;;  %v804_v18 = vadd.f32 %v786_v14, %v727_v12 }
 0x1bf   : > { %v788_v19 = vpop.f32.mrf.mxu1 }
 0x1c0   : > { %812 = vst [vmem:[%s1247_s22 + $0x8] sm:$0xff] %v804_v18  ;;  %v805_v22 = vadd.f32 %v788_v19, %v728_v17 }
 0x1c1   : > { %v790_v24 = vpop.f32.mrf.mxu1 }
 0x1c2   : > { %813 = vst [vmem:[%s1247_s22 + $0x10] sm:$0xff] %v805_v22  ;;  %v806_v27 = vadd.f32 %v790_v24, %v729_v21 }
 0x1c3   : > { %v794_v28 = vpop.f32.mrf.mxu1 }
 0x1c4   : > { %814 = vst [vmem:[%s1247_s22 + $0x18] sm:$0xff] %v806_v27  ;;  %v807_v31 = vadd.f32 %v794_v28, %v730_v26 }
 0x1c5   : > { %v796_v33 = vpop.f32.mrf.mxu1 }
 0x1c6   : > { %815 = vst [vmem:[%s1247_s22 + $0x20] sm:$0xff] %v807_v31  ;;  %v808_v35 = vadd.f32 %v796_v33, %v731_v30 }
 0x1c7   : > { %v798_v36 = vpop.f32.mrf.mxu1 }
 0x1c8   : > { %816 = vst [vmem:[%s1247_s22 + $0x28] sm:$0xff] %v808_v35  ;;  %v809_v38 = vadd.f32 %v798_v36, %v732_v34 }
 0x1c9   : > { %v800_v39 = vpop.f32.mrf.mxu1 }
 0x1ca   : > { %817 = vst [vmem:[%s1247_s22 + $0x30] sm:$0xff] %v809_v38  ;;  %v810_v40 = vadd.f32 %v800_v39, %v733_v37 }
 0x1cc   : > { %818 = vst [vmem:[%s1247_s22 + $0x38] sm:$0xff] %v810_v40 }
 0x1cd PF: > { %s14_s17 = sadd.s32 1, %s1080_s17   ;;  %s1271_s15 = smov %s1076_s16 }
 0x1ce   : > { %p11_p5 = scmp.ge.s32.totalorder %s14_s17, 4   ;;  %s1272_s16 = smov %s1274_s18 }
 0x1d0   :  { %13 = sbr.rel (!%p11_p5) target bundleno = 2 (0x2), region = 74 }

</bundles_post_ra>
